<compile_context>
chip_gen: v7x
topology: tpu7x:2x2x1
jax: 0.10.0
libtpu: 0.0.40
codegen_flags: <defaults>
</compile_context>

<pallas_src>
import jax
import jax.numpy as jnp
from jax.experimental import pallas as pl
from jax.experimental.pallas import tpu as pltpu


def _round_up(a, m):
    return ((a + m - 1) // m) * m


def _vmem_limit_bytes():
    """Generation-aware scoped-VMEM limit: 3/4 of physical VMEM (96 MiB v5e/v6e, 48 MiB v7x)."""
    phys = None
    try:
        phys = getattr(pltpu.get_tpu_info(), "vmem_capacity_bytes", None)
    except Exception:
        phys = None
    if not phys or phys <= 0:
        phys = 64 * 1024 * 1024  # conservative fallback (v7x per-TC physical VMEM)
    return int(phys) * 3 // 4


def _pick_tm(n, d, c, vmem_limit, *, x_buf_cap_bytes=8 * 1024 * 1024,
             min_blocks=8, reserve_bytes=4 * 1024 * 1024):
    """Batch tile size TM: byte-budgeted (lane-padding aware), VMEM-fitting, G >= min_blocks."""
    d_pad = _round_up(d, 128)
    # VMEM residents: W (single-buffered, lane-padded) + b (one (8,128) tile).
    w_bytes = _round_up(d, 8) * _round_up(c, 128) * 4
    b_bytes = 8 * 128 * 4
    # Per batch row, double-buffered: lane-padded x row + lane-padded (TM,1) output row.
    per_row = 2 * (d_pad + 128) * 4
    avail = max(vmem_limit - w_bytes - b_bytes - reserve_bytes, per_row * 8)
    tm_vmem = max(8, (avail // per_row) // 8 * 8)
    # Cap each x buffer at ~8 MiB; MiB-scale tiles already sit at ~85%+ of HBM roofline.
    tm_cap = max(8, (x_buf_cap_bytes // (d_pad * 4)) // 8 * 8)
    tm = min(tm_vmem, tm_cap, _round_up(n, 8))
    # Keep >= min_blocks grid steps (down to TM=8) so the "parallel" batch axis can
    # shard across both TensorCores on v7x and the DMA pipeline has depth.
    while tm > 8 and pl.cdiv(n, tm) < min_blocks:
        tm = max(8, _round_up(tm // 2, 8))
    return tm


def and_node_kernel(x_ref, w_ref, b_ref, o_ref):
    # x_ref: (TM, D), w_ref: (D, C), b_ref: (1, C), o_ref: (TM, 1)
    x = x_ref[...]
    w = w_ref[...]
    b = b_ref[...].astype(jnp.float32)

    # child_outputs = cat([child_i(x)], dim=1) == x @ W + b, f32 accumulation on the MXU.
    # Single broadcasted bias add (hoisted; not re-broadcast per column).
    child_outputs = jnp.dot(x, w, preferred_element_type=jnp.float32) + b

    c = child_outputs.shape[1]
    if c <= 8:
        # AND gate: short unrolled multiply chain over the child columns.
        prod = child_outputs[:, 0:1]
        for j in range(1, c):
            prod = prod * child_outputs[:, j:j + 1]
    else:
        # Log-depth cross-lane product for wider gates.
        prod = jnp.prod(child_outputs, axis=1, keepdims=True)

    o_ref[...] = prod.astype(o_ref.dtype)


def _resident_spec(shape):
    """Constant-index (VMEM-resident) operand; single-buffered when supported."""
    try:
        return pl.BlockSpec(shape, lambda i: (0, 0), pipeline_mode=pl.Buffered(1))
    except Exception:  # older BlockSpec without pipeline_mode / buffer_count constraint
        return pl.BlockSpec(shape, lambda i: (0, 0))


def and_node_forward(x, w, b, *, tm=None):
    """x: (N, D), w: (D, C), b: (1, C) or (C,)  ->  (N, 1) float32."""
    N, D = x.shape
    Dw, C = w.shape
    assert Dw == D, (Dw, D)
    b2 = jnp.reshape(b, (1, C)).astype(jnp.float32)

    vmem_limit = _vmem_limit_bytes()
    TM = tm if tm is not None else _pick_tm(N, D, C, vmem_limit)
    G = pl.cdiv(N, TM)

    cost = pl.CostEstimate(
        flops=2 * N * D * C + 2 * N * C,
        transcendentals=0,
        bytes_accessed=4 * (N * D + D * C + C + N),
    )

    # No jnp.pad and no output slicing: Pallas masks the partial last block, so x is
    # read from HBM exactly once and only valid output rows are written back.
    out = pl.pallas_call(
        and_node_kernel,
        out_shape=jax.ShapeDtypeStruct((N, 1), jnp.float32),
        grid_spec=pltpu.PrefetchScalarGridSpec(
            num_scalar_prefetch=0,
            grid=(G,),
            in_specs=[
                # x: one (TM, D) tile per grid step -> double-buffered, streamed.
                pl.BlockSpec((TM, D), lambda i: (i, 0)),
                # W, b: constant index_map -> fetched once, stay resident in VMEM.
                _resident_spec((D, C)),
                _resident_spec((1, C)),
            ],
            out_specs=pl.BlockSpec((TM, 1), lambda i: (i, 0)),
        ),
        compiler_params=pltpu.CompilerParams(
            dimension_semantics=("parallel",),   # megacore-shardable batch axis (v7x)
            vmem_limit_bytes=vmem_limit,         # generation-aware scoped-VMEM budget
        ),
        cost_estimate=cost,
    )(x, w, b2)

    return out


def and_node_reference(x, w, b):
    co = x.astype(jnp.float32) @ w.astype(jnp.float32) + jnp.reshape(b, (1, -1)).astype(jnp.float32)
    return jnp.prod(co, axis=1, keepdims=True)


if __name__ == "__main__":
    key = jax.random.PRNGKey(0)

    def run_case(N, D, C, tm=None):
        kx, kw, kb = jax.random.split(jax.random.fold_in(key, N * 131 + D * 7 + C), 3)
        x = jax.random.normal(kx, (N, D), dtype=jnp.float32)
        # Deterministic synthetic child-node params (each child: Linear(D -> 1)).
        w = 0.1 * jax.random.normal(kw, (D, C), dtype=jnp.float32)
        b = 0.1 * jax.random.normal(kb, (1, C), dtype=jnp.float32)

        out = jax.block_until_ready(and_node_forward(x, w, b, tm=tm))
        ref = and_node_reference(x, w, b)
        assert out.shape == (N, 1), out.shape
        assert jnp.allclose(out, ref, atol=1e-4, rtol=1e-4), (out, ref)

    # Multi-tile grid with a masked partial last block (300 = 2*128 + 44), no jnp.pad.
    run_case(300, 64, 4, tm=128)
    # Ragged small batch, auto TM (shrinks to TM=8, G=7).
    run_case(52, 32, 3)
    # Auto TM path keeping G >= 8 for megacore sharding (TM=48, G=8).
    run_case(384, 64, 4)

    print("KERNEL_OK")
</pallas_src>

<mosaic_0001>
module attributes {stable_mosaic.version = 11 : i64} {
  func.func @and_node_kernel(%arg0: i32, %arg1: memref<128x64xf32, #tpu.memory_space<vmem>>, %arg2: memref<64x4xf32, #tpu.memory_space<vmem>>, %arg3: memref<1x4xf32, #tpu.memory_space<vmem>>, %arg4: memref<128x1xf32, #tpu.memory_space<vmem>>) attributes {dimension_semantics = [#tpu.dimension_semantics<parallel>], iteration_bounds = array<i64: 3>, scalar_prefetch = 0 : i64, scratch_operands = 0 : i64, tpu.core_type = #tpu.core_type<tc>, window_params = [{transform_indices = @transform_0, window_bounds = array<i64: 128, 64>}, {pipeline_mode = #tpu.pipeline_mode<synchronous>, transform_indices = @transform_1, window_bounds = array<i64: 64, 4>}, {pipeline_mode = #tpu.pipeline_mode<synchronous>, transform_indices = @transform_2, window_bounds = array<i64: 1, 4>}, {transform_indices = @transform_3, window_bounds = array<i64: 128, 1>}]} {
    %c0 = arith.constant 0 : index
    %c0_0 = arith.constant 0 : index
    %0 = vector.load %arg1[%c0, %c0_0] : memref<128x64xf32, #tpu.memory_space<vmem>>, vector<128x64xf32>
    %c0_1 = arith.constant 0 : index
    %c0_2 = arith.constant 0 : index
    %1 = vector.load %arg2[%c0_1, %c0_2] : memref<64x4xf32, #tpu.memory_space<vmem>>, vector<64x4xf32>
    %c0_3 = arith.constant 0 : index
    %c0_4 = arith.constant 0 : index
    %2 = vector.load %arg3[%c0_3, %c0_4] : memref<1x4xf32, #tpu.memory_space<vmem>>, vector<1x4xf32>
    %cst = arith.constant dense<0.000000e+00> : vector<128x4xf32>
    %3 = tpu.matmul %0, %1, %cst {dimension_numbers = #tpu.dot_dimension_numbers<[1], [0], [0], [1], [0, 0, 1, 1], [], []>} : vector<128x64xf32>, vector<64x4xf32>, vector<128x4xf32> -> vector<128x4xf32>
    %4 = vector.broadcast %2 : vector<1x4xf32> to vector<128x4xf32>
    %5 = arith.addf %3, %4 : vector<128x4xf32>
    %6 = vector.extract_strided_slice %5 {offsets = [0, 0], sizes = [128, 1], strides = [1, 1]} : vector<128x4xf32> to vector<128x1xf32>
    %7 = vector.extract_strided_slice %5 {offsets = [0, 1], sizes = [128, 1], strides = [1, 1]} : vector<128x4xf32> to vector<128x1xf32>
    %8 = arith.mulf %6, %7 : vector<128x1xf32>
    %9 = vector.extract_strided_slice %5 {offsets = [0, 2], sizes = [128, 1], strides = [1, 1]} : vector<128x4xf32> to vector<128x1xf32>
    %10 = arith.mulf %8, %9 : vector<128x1xf32>
    %11 = vector.extract_strided_slice %5 {offsets = [0, 3], sizes = [128, 1], strides = [1, 1]} : vector<128x4xf32> to vector<128x1xf32>
    %12 = arith.mulf %10, %11 : vector<128x1xf32>
    %c0_5 = arith.constant 0 : index
    %c0_6 = arith.constant 0 : index
    %13 = vector.load %arg4[%c0_5, %c0_6] : memref<128x1xf32, #tpu.memory_space<vmem>>, vector<128x1xf32>
    tpu.vector_store %arg4[%c0_5, %c0_6], %12 {strides = array<i32>} : memref<128x1xf32, #tpu.memory_space<vmem>>, vector<128x1xf32>,
    return
  }
  func.func @transform_0(%arg0: i32) -> (i32, i32) {
    %c0_i32 = arith.constant 0 : i32
    %c0_i32_0 = arith.constant 0 : i32
    return %arg0, %c0_i32 : i32, i32
  }
  func.func @transform_1(%arg0: i32) -> (i32, i32) {
    %c0_i32 = arith.constant 0 : i32
    %c0_i32_0 = arith.constant 0 : i32
    %c0_i32_1 = arith.constant 0 : i32
    return %c0_i32, %c0_i32_0 : i32, i32
  }
  func.func @transform_2(%arg0: i32) -> (i32, i32) {
    %c0_i32 = arith.constant 0 : i32
    %c0_i32_0 = arith.constant 0 : i32
    %c0_i32_1 = arith.constant 0 : i32
    return %c0_i32, %c0_i32_0 : i32, i32
  }
  func.func @transform_3(%arg0: i32) -> (i32, i32) {
    %c0_i32 = arith.constant 0 : i32
    %c0_i32_0 = arith.constant 0 : i32
    return %arg0, %c0_i32 : i32, i32
  }
}

</mosaic_0001>

<bundles_post_ra>
// kernel: tpu_custom_call.1
= control target key start
LH: loop header
LB: loop body
LE: loop exit
PB: predicated region body
PF: predicated region fallthrough
CT: control target
= control target key end

     0   :  { %s1251_s12 = smov 0   ;;  %s1253_s13 = smov 0   ;;  %s1628_s0 = inlined_call_operand.vmem [shape: f32[300,64], index: 0, kind: input, shape index: {}]   ;;  %s1629_s1 = inlined_call_operand.vmem [shape: f32[64,4], index: 1, kind: input, shape index: {}]   ;;  %s1630_s2 = inlined_call_operand.vmem [shape: f32[1,4], index: 2, kind: input, shape index: {}]   ;;  %s1631_s3 = inlined_call_operand.vmem [shape: f32[300,1], index: 3, kind: output, shape index: {}]  }
   0x1   :  { %s1255_s14 = smov 0  }
   0x2 LB: > { %s1264_s15 = sadd.s32 4294967295, %s1194_s14   ;;  %s1266_s16 = sadd.s32 1, %s1194_s14   ;;  %s1194_s14 = sphi %s1255_s14, %s1638_s14   ;;  %s1190_s13 = sphi %s1253_s13, %s1637_s13   ;;  %s1186_s12 = sphi %s1251_s12, %s1636_s12  }
   0x3   : > { %s85_s17 = ssub.s32 %s1194_s14, %s1266_s16  ;;  %s88_s18 = sadd.s32 1, %s1190_s13 }
   0x4   : > { %p86_p0 = scmp.eq.s32.totalorder %s85_s17, 0  ;;  %p98_p1 = scmp.ne.s32.totalorder %s1190_s13, %s1186_s12 }
   0x5   : > { %p99_p2 = scmp.eq.s32.totalorder %s1264_s15, 2  ;;  %p920_p3 = scmp.ge.s32.totalorder %s1194_s14, 1 }
   0x6   : > { %s1274_s19 = scalar_select %p86_p0, %s1190_s13, %s88_s18  }
   0x7   : > { %p1276_p4 = por %p99_p2, %p98_p1  ;;  %p146_p5 = scmp.lt.s32.totalorder %s1194_s14, 4 }
   0x9   : > { %p147_p6 = pnand %p920_p3, %p146_p5 }
   0xa   : > { %v208_v0 = vld [vmem:[%s1629_s1] sm:$0xff] (!%p147_p6)  ;;  %v209_v1 = vld [vmem:[%s1629_s1 + $0x8] sm:$0xff] (!%p147_p6)  ;;  %v210_v2 = vld [vmem:[%s1629_s1 + $0x10] sm:$0xff] (!%p147_p6)  ;;  %s1290_s27 = sshll.u32 (!%p147_p6), %s1264_s15, 4  ;;  %vm223_vm0 = vcmask (!%p147_p6), 523264   ;;  %s1228_s24 = smov (!%p147_p6), 127  }
   0xb   : > { %150 = sbr.rel (%p147_p6) target bundleno = 502 (0x1f6), region = 32  ;;  %v1025_v3 = vpack.c.bf16 (!%p147_p6), %v209_v1, %v208_v0  ;;  %v211_v4 = vld [vmem:[%s1629_s1 + $0x18] sm:$0xff] (!%p147_p6)  ;;  %p178_p7 = scmp.lt.s32.totalorder (!%p147_p6), %s1290_s27, 37  ;;  %v212_v6 = vld [vmem:[%s1629_s1 + $0x20] sm:$0xff] (!%p147_p6)  ;;  %v213_v7 = vld [vmem:[%s1629_s1 + $0x28] sm:$0xff] (!%p147_p6)  ;;  %vm625_vm1 = vcmask (!%p147_p6), 7168  }
   0xc   : > { %v1029_v5 = vpack.c.bf16 (!%p147_p6), %v211_v4, %v210_v2  ;;  %v1033_v8 = vpack.c.bf16 (!%p147_p6), %v213_v7, %v212_v6  ;;  %v214_v9 = vld [vmem:[%s1629_s1 + $0x30] sm:$0xff] (!%p147_p6)  ;;  %v215_v10 = vld [vmem:[%s1629_s1 + $0x38] sm:$0xff] (!%p147_p6)  ;;  %v924_v28 = vld [vmem:[%s1630_s2] ss:$0 sm:$0xff] (!%p147_p6)  ;;  %s1229_s25 = smov (!%p147_p6), 126   ;;  %s1230_s26 = smov (!%p147_p6), 125  }
   0xd   : > { %1026 = vmatprep.subr.bf16.mxu0 (!%p147_p6), %v1025_v3  ;;  %1041 = vmatprep.subr.bf16.mxu1 (!%p147_p6), %v1025_v3  ;;  %v1037_v13 = vpack.c.bf16 (!%p147_p6), %v215_v10, %v214_v9  ;;  %s170_s28 = sand.u32 (!%p147_p6), 1, %s1186_s12  }
   0xe   : > { %1028 = vmatpush3.bf16.msra.mxu0 (!%p147_p6), %v1025_v3  ;;  %1045 = vmatpush3.bf16.msra.mxu1 (!%p147_p6), %v1025_v3  ;;  %s921_s29 = sshll.u32 (!%p147_p6), %s170_s28, 7 }
   0xf   : > { %1030 = vmatprep.subr.bf16.mxu0 (!%p147_p6), %v1029_v5  ;;  %1042 = vmatprep.subr.bf16.mxu1 (!%p147_p6), %v1029_v5  ;;  %s1480_s30 = scalar_lea.vmem (!%p147_p6), [#allocation2], %s921_s29  }
  0x12   : > { %s179_s7 = scalar_select %p178_p7, %s1290_s27, 37  ;;  %1032 = vmatpush3.bf16.msra.mxu0 %v1029_v5  ;;  %1046 = vmatpush3.bf16.msra.mxu1 %v1029_v5 }
  0x13   : > { %1034 = vmatprep.subr.bf16.mxu0 %v1033_v8  ;;  %1043 = vmatprep.subr.bf16.mxu1 %v1033_v8  ;;  %s650_s12 = ssub.s32 (%p1276_p4), 38, %s1290_s27  ;;  %s958_s4 = sshll.u32 (%p1276_p4), %s1264_s15, 7 }
  0x14   : > { %s923_s8 = sshll.u32 %s179_s7, 3  ;;  %p651_p8 = scmp.lt.s32.totalorder (%p1276_p4), %s650_s12, 16 }
  0x15   : > { %s1312_s21 = scalar_lea.vmem %s1628_s0, %s923_s8  ;;  %s1535_s7 = scalar_lea.vmem (%p1276_p4), %s1631_s3, %s958_s4  }
  0x16   : > { %v192_v11 = vld [vmem:[%s1312_s21] sm:$0xff]  ;;  %1036 = vmatpush3.bf16.msra.mxu0 %v1033_v8  ;;  %1047 = vmatpush3.bf16.msra.mxu1 %v1033_v8  ;;  %v193_v14 = vld [vmem:[%s1312_s21 + $0x8] sm:$0xff]  ;;  %v194_v16 = vld [vmem:[%s1312_s21 + $0x10] sm:$0xff] }
  0x17   : > { %v200_v12 = vld [vmem:[%s1312_s21 + $0x40] sm:$0xff]  ;;  %1001 = vmatprep.mubr.msk.f32.mxu0 %vm223_vm0, %v192_v11  ;;  %1038 = vmatprep.subr.bf16.mxu0 %v1037_v13  ;;  %v201_v15 = vld [vmem:[%s1312_s21 + $0x48] sm:$0xff]  ;;  %v202_v17 = vld [vmem:[%s1312_s21 + $0x50] sm:$0xff] }
  0x18   : > { %1013 = vmatprep.mubr.msk.f32.mxu1 %vm223_vm0, %v200_v12  ;;  %1044 = vmatprep.subr.bf16.mxu1 %v1037_v13  ;;  %v195_v18 = vld [vmem:[%s1312_s21 + $0x18] sm:$0xff]  ;;  %v196_v20 = vld [vmem:[%s1312_s21 + $0x20] sm:$0xff]  ;;  %v197_v22 = vld [vmem:[%s1312_s21 + $0x28] sm:$0xff] }
  0x19   : > { %v203_v19 = vld [vmem:[%s1312_s21 + $0x58] sm:$0xff]  ;;  %v204_v21 = vld [vmem:[%s1312_s21 + $0x60] sm:$0xff]  ;;  %v205_v23 = vld [vmem:[%s1312_s21 + $0x68] sm:$0xff] }
  0x1a   : > { %1040 = vmatpush3.bf16.msra.mxu0 %v1037_v13  ;;  %1048 = vmatpush3.bf16.msra.mxu1 %v1037_v13  ;;  %v198_v24 = vld [vmem:[%s1312_s21 + $0x30] sm:$0xff]  ;;  %v199_v26 = vld [vmem:[%s1312_s21 + $0x38] sm:$0xff] }
  0x1b   : > { %v206_v25 = vld [vmem:[%s1312_s21 + $0x70] sm:$0xff]  ;;  %v207_v27 = vld [vmem:[%s1312_s21 + $0x78] sm:$0xff] }
  0x1d   : > { %1002 = vmatmul.mubr.msk.f32.vlgmr.msra.gmra.mrb[0].mxu0 %vm223_vm0, %v193_v14  ;;  %1014 = vmatmul.mubr.msk.f32.vlgmr.msra.gmra.mrb[0].mxu1 %vm223_vm0, %v201_v15 }
  0x1e   : > { %1004 = vmatprep.mubr.msk.f32.mxu0 %vm223_vm0, %v194_v16  ;;  %1016 = vmatprep.mubr.msk.f32.mxu1 %vm223_vm0, %v202_v17 }
  0x21   : > { %1005 = vmatmul.mubr.msk.f32.gmra.mrb[2].mxu0 %vm223_vm0, %v195_v18  ;;  %1017 = vmatmul.mubr.msk.f32.gmra.mrb[2].mxu1 %vm223_vm0, %v203_v19 }
  0x22   : > { %1007 = vmatprep.mubr.msk.f32.mxu0 %vm223_vm0, %v196_v20  ;;  %1019 = vmatprep.mubr.msk.f32.mxu1 %vm223_vm0, %v204_v21 }
  0x25   : > { %1008 = vmatmul.mubr.msk.f32.gmra.mrb[4].mxu0 %vm223_vm0, %v197_v22  ;;  %1020 = vmatmul.mubr.msk.f32.gmra.mrb[4].mxu1 %vm223_vm0, %v205_v23 }
  0x26   : > { %1010 = vmatprep.mubr.msk.f32.mxu0 %vm223_vm0, %v198_v24  ;;  %1022 = vmatprep.mubr.msk.f32.mxu1 %vm223_vm0, %v206_v25 }
  0x29   : > { %1011 = vmatmul.mubr.msk.f32.gmra.mrb[6].mxu0 %vm223_vm0, %v199_v26  ;;  %1023 = vmatmul.mubr.msk.f32.gmra.mrb[6].mxu1 %vm223_vm0, %v207_v27 }
  0xf0   : > { %v1003_v29 = vpop.f32.mrb[0].mxu0  ;;  %v1015_v30 = vpop.f32.mrb[0].mxu1 }
  0xf1   : > { %v1349_v31 = vadd.f32 %v1003_v29, %v924_v28  ;;  %v1351_v32 = vadd.f32 %v1015_v30, %v924_v28  ;;  %v338_v33 = vpop.f32.mrb[1].mxu0  ;;  %v378_v34 = vpop.f32.mrb[1].mxu1 }
  0xf2   : > { %v1357_v37 = vadd.f32 %v924_v28, %v338_v33  ;;  %v1363_v42 = vadd.f32 %v924_v28, %v378_v34 }
  0xf3   : > { %451 = vrot.lane.b32.xlu1 %v1351_v32, %s1228_s24  ;;  %435 = vrot.lane.b32.xlu0 %v1349_v31, %s1228_s24 }
  0xf4   : > { %v1006_v35 = vpop.f32.mrb[2].mxu0  ;;  %v1018_v36 = vpop.f32.mrb[2].mxu1 }
  0xf5   : > { %v348_v38 = vpop.f32.mrb[3].mxu0  ;;  %v388_v39 = vpop.f32.mrb[3].mxu1  ;;  %v1383_v53 = vadd.f32 %v1006_v35, %v924_v28  ;;  %v1387_v54 = vadd.f32 %v1018_v36, %v924_v28 }
  0xf6   : > { %v1397_v55 = vadd.f32 %v924_v28, %v388_v39  ;;  %v1403_v56 = vadd.f32 %v924_v28, %v348_v38 }
  0xf7   : > { %499 = vrot.lane.b32.xlu1 %v1349_v31, %s1229_s25  ;;  %433 = vrot.lane.b32.xlu0 %v1357_v37, %s1228_s24 }
  0xf8   : > { %v1009_v40 = vpop.f32.mrb[4].mxu0  ;;  %v1021_v41 = vpop.f32.mrb[4].mxu1 }
  0xf9   : > { %v358_v43 = vpop.f32.mrb[5].mxu0  ;;  %v398_v44 = vpop.f32.mrb[5].mxu1  ;;  %v1417_v57 = vadd.f32 %v1009_v40, %v924_v28  ;;  %v1425_v59 = vadd.f32 %v1021_v41, %v924_v28 }
  0xfa   : > { %v1419_v58 = vadd.f32 %v924_v28, %v358_v43  ;;  %v1427_v60 = vadd.f32 %v924_v28, %v398_v44 }
  0xfb   : > { %515 = vrot.lane.b32.xlu1 %v1351_v32, %s1229_s25  ;;  %449 = vrot.lane.b32.xlu0 %v1363_v42, %s1228_s24 }
  0xfc   : > { %v1012_v45 = vpop.f32.mrb[6].mxu0  ;;  %v1024_v46 = vpop.f32.mrb[6].mxu1 }
  0xfd   : > { %v1369_v47 = vadd.f32 %v1012_v45, %v924_v28  ;;  %v368_v48 = vpop.f32.mrb[7].mxu0  ;;  %v1371_v49 = vadd.f32 %v1024_v46, %v924_v28  ;;  %v408_v50 = vpop.f32.mrb[7].mxu1 }
  0xfe   : > { %v1373_v51 = vadd.f32 %v924_v28, %v368_v48  ;;  %v1375_v52 = vadd.f32 %v924_v28, %v408_v50 }
  0xff   : > { %563 = vrot.lane.b32.xlu1 %v1349_v31, %s1230_s26  ;;  %497 = vrot.lane.b32.xlu0 %v1357_v37, %s1229_s25 }
 0x103   : > { %579 = vrot.lane.b32.xlu1 %v1351_v32, %s1230_s26  ;;  %513 = vrot.lane.b32.xlu0 %v1363_v42, %s1229_s25 }
 0x107   : > { %439 = vrot.lane.b32.xlu1 %v1383_v53, %s1228_s24  ;;  %561 = vrot.lane.b32.xlu0 %v1357_v37, %s1230_s26 }
 0x10b   : > { %455 = vrot.lane.b32.xlu1 %v1387_v54, %s1228_s24  ;;  %577 = vrot.lane.b32.xlu0 %v1363_v42, %s1230_s26 }
 0x10f   : > { %503 = vrot.lane.b32.xlu1 %v1383_v53, %s1229_s25  ;;  %453 = vrot.lane.b32.xlu0 %v1397_v55, %s1228_s24 }
 0x113   : > { %519 = vrot.lane.b32.xlu1 %v1387_v54, %s1229_s25  ;;  %501 = vrot.lane.b32.xlu0 %v1403_v56, %s1229_s25 }
 0x117   : > { %567 = vrot.lane.b32.xlu1 %v1383_v53, %s1230_s26  ;;  %517 = vrot.lane.b32.xlu0 %v1397_v55, %s1229_s25 }
 0x11b   : > { %583 = vrot.lane.b32.xlu1 %v1387_v54, %s1230_s26  ;;  %565 = vrot.lane.b32.xlu0 %v1403_v56, %s1230_s26 }
 0x11f   : > { %437 = vrot.lane.b32.xlu1 %v1403_v56, %s1228_s24  ;;  %581 = vrot.lane.b32.xlu0 %v1397_v55, %s1230_s26 }
 0x123   : > { %443 = vrot.lane.b32.xlu1 %v1417_v57, %s1228_s24  ;;  %441 = vrot.lane.b32.xlu0 %v1419_v58, %s1228_s24 }
 0x127   : > { %459 = vrot.lane.b32.xlu1 %v1425_v59, %s1228_s24  ;;  %457 = vrot.lane.b32.xlu0 %v1427_v60, %s1228_s24 }
 0x12b   : > { %507 = vrot.lane.b32.xlu1 %v1417_v57, %s1229_s25  ;;  %505 = vrot.lane.b32.xlu0 %v1419_v58, %s1229_s25 }
 0x12f   : > { %523 = vrot.lane.b32.xlu1 %v1425_v59, %s1229_s25  ;;  %521 = vrot.lane.b32.xlu0 %v1427_v60, %s1229_s25 }
 0x133   : > { %571 = vrot.lane.b32.xlu1 %v1417_v57, %s1230_s26  ;;  %569 = vrot.lane.b32.xlu0 %v1419_v58, %s1230_s26 }
 0x137   : > { %587 = vrot.lane.b32.xlu1 %v1425_v59, %s1230_s26  ;;  %585 = vrot.lane.b32.xlu0 %v1427_v60, %s1230_s26 }
 0x13b   : > { %447 = vrot.lane.b32.xlu1 %v1369_v47, %s1228_s24  ;;  %445 = vrot.lane.b32.xlu0 %v1373_v51, %s1228_s24 }
 0x13f   : > { %463 = vrot.lane.b32.xlu1 %v1371_v49, %s1228_s24  ;;  %461 = vrot.lane.b32.xlu0 %v1375_v52, %s1228_s24 }
 0x143   : > { %511 = vrot.lane.b32.xlu1 %v1369_v47, %s1229_s25  ;;  %509 = vrot.lane.b32.xlu0 %v1373_v51, %s1229_s25 }
 0x147   : > { %527 = vrot.lane.b32.xlu1 %v1371_v49, %s1229_s25  ;;  %525 = vrot.lane.b32.xlu0 %v1375_v52, %s1229_s25 }
 0x14b   : > { %575 = vrot.lane.b32.xlu1 %v1369_v47, %s1230_s26  ;;  %573 = vrot.lane.b32.xlu0 %v1373_v51, %s1230_s26 }
 0x14f   : > { %591 = vrot.lane.b32.xlu1 %v1371_v49, %s1230_s26  ;;  %589 = vrot.lane.b32.xlu0 %v1375_v52, %s1230_s26 }
 0x165   : > { %v452_v61 = vpop.permute.xlu1 %451  ;;  %v436_v62 = vpop.permute.xlu0 %435 }
 0x166   : > { %v482_v3 = vmul.f32 %v436_v62, %v1349_v31  ;;  %v490_v7 = vmul.f32 %v452_v61, %v1351_v32 }
 0x169   : > { %v500_v63 = vpop.permute.xlu1 %499  ;;  %v434_v0 = vpop.permute.xlu0 %433 }
 0x16a   : > { %v546_v4 = vmul.f32 %v500_v63, %v482_v3  ;;  %v481_v12 = vmul.f32 %v434_v0, %v1357_v37 }
 0x16d   : > { %v516_v1 = vpop.permute.xlu1 %515  ;;  %v450_v2 = vpop.permute.xlu0 %449 }
 0x16e   : > { %v554_v9 = vmul.f32 %v516_v1, %v490_v7  ;;  %v489_v17 = vmul.f32 %v450_v2, %v1363_v42 }
 0x171   : > { %v564_v5 = vpop.permute.xlu1 %563  ;;  %v498_v6 = vpop.permute.xlu0 %497 }
 0x172   : > { %v610_v8 = vmul.f32 %v564_v5, %v546_v4  ;;  %v545_v14 = vmul.f32 %v498_v6, %v481_v12 }
 0x174   : > { %627 = vst.msk [vmem:[%s1480_s30 + $0x8] sm:$0xff] %vm625_vm1, %v610_v8 }
 0x175   : > { %v580_v10 = vpop.permute.xlu1 %579  ;;  %v514_v11 = vpop.permute.xlu0 %513 }
 0x176   : > { %v618_v13 = vmul.f32 %v580_v10, %v554_v9  ;;  %v553_v19 = vmul.f32 %v514_v11, %v489_v17 }
 0x178   : > { %635 = vst.msk [vmem:[%s1480_s30 + $0x48] sm:$0xff] %vm625_vm1, %v618_v13 }
 0x179   : > { %v440_v15 = vpop.permute.xlu1 %439  ;;  %v562_v16 = vpop.permute.xlu0 %561 }
 0x17a   : > { %v609_v18 = vmul.f32 %v562_v16, %v545_v14  ;;  %v484_v27 = vmul.f32 %v440_v15, %v1383_v53 }
 0x17c   : > { %626 = vst.msk [vmem:[%s1480_s30] sm:$0xff] %vm625_vm1, %v609_v18 }
 0x17d   : > { %v456_v20 = vpop.permute.xlu1 %455  ;;  %v578_v21 = vpop.permute.xlu0 %577 }
 0x17e   : > { %v617_v22 = vmul.f32 %v578_v21, %v553_v19  ;;  %v492_v31 = vmul.f32 %v456_v20, %v1387_v54 }
 0x180   : > { %634 = vst.msk [vmem:[%s1480_s30 + $0x40] sm:$0xff] %vm625_vm1, %v617_v22 }
 0x181   : > { %v504_v23 = vpop.permute.xlu1 %503  ;;  %v454_v24 = vpop.permute.xlu0 %453 }
 0x182   : > { %v548_v28 = vmul.f32 %v504_v23, %v484_v27  ;;  %v491_v36 = vmul.f32 %v454_v24, %v1397_v55 }
 0x185   : > { %v520_v25 = vpop.permute.xlu1 %519  ;;  %v502_v26 = vpop.permute.xlu0 %501 }
 0x186   : > { %v556_v33 = vmul.f32 %v520_v25, %v492_v31 }
 0x189   : > { %v568_v29 = vpop.permute.xlu1 %567  ;;  %v518_v30 = vpop.permute.xlu0 %517 }
 0x18a   : > { %v612_v32 = vmul.f32 %v568_v29, %v548_v28  ;;  %v555_v38 = vmul.f32 %v518_v30, %v491_v36 }
 0x18c   : > { %629 = vst.msk [vmem:[%s1480_s30 + $0x18] sm:$0xff] %vm625_vm1, %v612_v32 }
 0x18d   : > { %v584_v34 = vpop.permute.xlu1 %583  ;;  %v566_v35 = vpop.permute.xlu0 %565 }
 0x18e   : > { %v620_v37 = vmul.f32 %v584_v34, %v556_v33 }
 0x190   : > { %637 = vst.msk [vmem:[%s1480_s30 + $0x58] sm:$0xff] %vm625_vm1, %v620_v37 }
 0x191   : > { %v438_v39 = vpop.permute.xlu1 %437  ;;  %v582_v40 = vpop.permute.xlu0 %581 }
 0x192   : > { %v483_v41 = vmul.f32 %v438_v39, %v1403_v56  ;;  %v619_v42 = vmul.f32 %v582_v40, %v555_v38 }
 0x194   : > { %v547_v43 = vmul.f32 %v502_v26, %v483_v41  ;;  %636 = vst.msk [vmem:[%s1480_s30 + $0x50] sm:$0xff] %vm625_vm1, %v619_v42 }
 0x195   : > { %v444_v44 = vpop.permute.xlu1 %443  ;;  %v442_v45 = vpop.permute.xlu0 %441 }
 0x196   : > { %v611_v46 = vmul.f32 %v566_v35, %v547_v43  ;;  %v486_v62 = vmul.f32 %v444_v44, %v1417_v57  ;;  %v485_v56 = vmul.f32 %v442_v45, %v1419_v58 }
 0x198   : > { %628 = vst.msk [vmem:[%s1480_s30 + $0x10] sm:$0xff] %vm625_vm1, %v611_v46 }
 0x199   : > { %v460_v48 = vpop.permute.xlu1 %459  ;;  %v458_v50 = vpop.permute.xlu0 %457 }
 0x19a   : > { %v494_v3 = vmul.f32 %v460_v48, %v1425_v59  ;;  %v493_v4 = vmul.f32 %v458_v50, %v1427_v60 }
 0x19d   : > { %v508_v53 = vpop.permute.xlu1 %507  ;;  %v506_v54 = vpop.permute.xlu0 %505 }
 0x19e   : > { %v550_v63 = vmul.f32 %v508_v53, %v486_v62  ;;  %v549_v0 = vmul.f32 %v506_v54, %v485_v56 }
 0x1a1   : > { %v524_v55 = vpop.permute.xlu1 %523  ;;  %v522_v61 = vpop.permute.xlu0 %521 }
 0x1a2   : > { %v558_v7 = vmul.f32 %v524_v55, %v494_v3  ;;  %v557_v8 = vmul.f32 %v522_v61, %v493_v4 }
 0x1a5   : > { %v572_v1 = vpop.permute.xlu1 %571  ;;  %v570_v2 = vpop.permute.xlu0 %569 }
 0x1a6   : > { %v614_v5 = vmul.f32 %v572_v1, %v550_v63  ;;  %v613_v6 = vmul.f32 %v570_v2, %v549_v0 }
 0x1a8   : > { %631 = vst.msk [vmem:[%s1480_s30 + $0x28] sm:$0xff] %vm625_vm1, %v614_v5  ;;  %630 = vst.msk [vmem:[%s1480_s30 + $0x20] sm:$0xff] %vm625_vm1, %v613_v6 }
 0x1a9   : > { %v588_v57 = vpop.permute.xlu1 %587  ;;  %v586_v58 = vpop.permute.xlu0 %585 }
 0x1aa   : > { %v622_v9 = vmul.f32 %v588_v57, %v558_v7  ;;  %v621_v10 = vmul.f32 %v586_v58, %v557_v8 }
 0x1ac   : > { %639 = vst.msk [vmem:[%s1480_s30 + $0x68] sm:$0xff] %vm625_vm1, %v622_v9  ;;  %638 = vst.msk [vmem:[%s1480_s30 + $0x60] sm:$0xff] %vm625_vm1, %v621_v10 }
 0x1ad   : > { %v448_v11 = vpop.permute.xlu1 %447  ;;  %v446_v59 = vpop.permute.xlu0 %445 }
 0x1ae   : > { %v488_v17 = vmul.f32 %v448_v11, %v1369_v47  ;;  %v487_v18 = vmul.f32 %v446_v59, %v1373_v51 }
 0x1b1   : > { %v464_v12 = vpop.permute.xlu1 %463  ;;  %v462_v60 = vpop.permute.xlu0 %461 }
 0x1b2   : > { %v496_v23 = vmul.f32 %v464_v12, %v1371_v49  ;;  %v495_v24 = vmul.f32 %v462_v60, %v1375_v52 }
 0x1b5   : > { %v512_v13 = vpop.permute.xlu1 %511  ;;  %v510_v14 = vpop.permute.xlu0 %509 }
 0x1b6   : > { %v552_v19 = vmul.f32 %v512_v13, %v488_v17  ;;  %v551_v20 = vmul.f32 %v510_v14, %v487_v18 }
 0x1b9   : > { %v528_v15 = vpop.permute.xlu1 %527  ;;  %v526_v16 = vpop.permute.xlu0 %525 }
 0x1ba   : > { %v560_v27 = vmul.f32 %v528_v15, %v496_v23  ;;  %v559_v28 = vmul.f32 %v526_v16, %v495_v24 }
 0x1bd   : > { %v576_v21 = vpop.permute.xlu1 %575  ;;  %v574_v22 = vpop.permute.xlu0 %573 }
 0x1be   : > { %v616_v25 = vmul.f32 %v576_v21, %v552_v19  ;;  %v615_v26 = vmul.f32 %v574_v22, %v551_v20  ;;  %648 = sbr.rel (!%p1276_p4) target bundleno = 502 (0x1f6), region = 36 }
 0x1c0   : > { %633 = vst.msk [vmem:[%s1480_s30 + $0x38] sm:$0xff] %vm625_vm1, %v616_v25  ;;  %632 = vst.msk [vmem:[%s1480_s30 + $0x30] sm:$0xff] %vm625_vm1, %v615_v26 }
 0x1c1   : > { %v592_v47 = vpop.permute.xlu1 %591  ;;  %v590_v51 = vpop.permute.xlu0 %589 }
 0x1c2   : > { %v624_v29 = vmul.f32 %v592_v47, %v560_v27  ;;  %v623_v30 = vmul.f32 %v590_v51, %v559_v28 }
 0x1c4   : > { %641 = vst.msk [vmem:[%s1480_s30 + $0x78] sm:$0xff] %vm625_vm1, %v624_v29  ;;  %640 = vst.msk [vmem:[%s1480_s30 + $0x70] sm:$0xff] %vm625_vm1, %v623_v30 }
 0x1c5   : > { %s1640_s12 = smov (!%p651_p8, %s650_s12), 16 }
 0x1c6   : > { %s943_s8 = sshll.u32 %s1640_s12, 7 }
 0x1c7   : > { %p946_p9 = scmp.eq.s32.totalorder %s943_s8, 0 }
 0x1c8   : > { %s1541_s9 = sshrl.u32 (!%p946_p9), %s1640_s12, 4 }
 0x1c9   : > { %659 = sbr.rel (%p946_p9) target bundleno = 502 (0x1f6), region = 40  ;;  %p947_p10 = scmp.le.s32.totalorder (!%p946_p9), %s1541_s9, 0 }
 0x1d0   : > { %873 = sbr.rel (%p947_p10) target bundleno = 481 (0x1e1), region = 116  ;;  %s1633_s15 = smov (!%p947_p10), %s1535_s7 }
 0x1d1   : > { %s1634_s20 = smov (!%p947_p10), %s1480_s30  ;;  %s1550_s27 = smov (!%p947_p10), 0  }
 0x1d2   : > { %s1552_s10 = smov (!%p947_p10), 0  }
 0x1d7 LB: >> { %v751_v49 = vld [vmem:[%s1202_s20] sm:$0xff]  ;;  %v753_v52 = vld [vmem:[%s1202_s20 + $0x8] sm:$0xff]  ;;  %v755_v31 = vld [vmem:[%s1202_s20 + $0x10] sm:$0xff]  ;;  %s783_s11 = sadd.s32 1, %s1206_s27  ;;  %s745_s10 = sadd.s32 1, %s1210_s10   ;;  %s1210_s10 = sphi %s1552_s10, %s745_s10   ;;  %s1206_s27 = sphi %s1550_s27, %s1635_s27   ;;  %s1202_s20 = sphi %s1634_s20, %s788_s20   ;;  %s1198_s15 = sphi %s1633_s15, %s789_s15  }
 0x1d8   : >> { %752 = vst [vmem:[%s1198_s15] sm:$0xff] %v751_v49  ;;  %754 = vst [vmem:[%s1198_s15 + $0x8] sm:$0xff] %v753_v52  ;;  %v757_v32 = vld [vmem:[%s1202_s20 + $0x18] sm:$0xff]  ;;  %v759_v33 = vld [vmem:[%s1202_s20 + $0x20] sm:$0xff]  ;;  %p784_p11 = scmp.ge.s32.totalorder %s783_s11, %s1541_s9  ;;  %p744_p12 = scmp.ge.s32.totalorder %s745_s10, %s1541_s9 }
 0x1d9   : >> { %756 = vst [vmem:[%s1198_s15 + $0x10] sm:$0xff] %v755_v31  ;;  %v761_v34 = vld [vmem:[%s1202_s20 + $0x28] sm:$0xff]  ;;  %758 = vst [vmem:[%s1198_s15 + $0x18] sm:$0xff] %v757_v32  ;;  %v763_v35 = vld [vmem:[%s1202_s20 + $0x30] sm:$0xff] }
 0x1da   : >> { %760 = vst [vmem:[%s1198_s15 + $0x20] sm:$0xff] %v759_v33  ;;  %762 = vst [vmem:[%s1198_s15 + $0x28] sm:$0xff] %v761_v34  ;;  %v765_v36 = vld [vmem:[%s1202_s20 + $0x38] sm:$0xff]  ;;  %v767_v37 = vld [vmem:[%s1202_s20 + $0x40] sm:$0xff]  ;;  %s1642_s11 = smov (%p784_p11, %s783_s11), 0  ;;  %747 = sbr.rel (!%p744_p12) target bundleno = 471 (0x1d7), region = 122 }
 0x1db   : >> { %764 = vst [vmem:[%s1198_s15 + $0x30] sm:$0xff] %v763_v35  ;;  %766 = vst [vmem:[%s1198_s15 + $0x38] sm:$0xff] %v765_v36  ;;  %v769_v38 = vld [vmem:[%s1202_s20 + $0x48] sm:$0xff]  ;;  %v771_v39 = vld [vmem:[%s1202_s20 + $0x50] sm:$0xff]  ;;  %s948_s14 = sshll.u32 %s1642_s11, 7  ;;  %s1635_s27 = smov %s1642_s11 }
 0x1dc   : >> { %768 = vst [vmem:[%s1198_s15 + $0x40] sm:$0xff] %v767_v37  ;;  %v773_v40 = vld [vmem:[%s1202_s20 + $0x58] sm:$0xff]  ;;  %770 = vst [vmem:[%s1198_s15 + $0x48] sm:$0xff] %v769_v38  ;;  %v775_v41 = vld [vmem:[%s1202_s20 + $0x60] sm:$0xff] }
 0x1dd   : >> { %772 = vst [vmem:[%s1198_s15 + $0x50] sm:$0xff] %v771_v39  ;;  %774 = vst [vmem:[%s1198_s15 + $0x58] sm:$0xff] %v773_v40  ;;  %v777_v42 = vld [vmem:[%s1202_s20 + $0x68] sm:$0xff]  ;;  %v779_v43 = vld [vmem:[%s1202_s20 + $0x70] sm:$0xff] }
 0x1de   : >> { %776 = vst [vmem:[%s1198_s15 + $0x60] sm:$0xff] %v775_v41  ;;  %778 = vst [vmem:[%s1198_s15 + $0x68] sm:$0xff] %v777_v42  ;;  %v781_v44 = vld [vmem:[%s1202_s20 + $0x78] sm:$0xff]  ;;  %s788_s20 = scalar_lea.vmem %s1480_s30, %s948_s14 [#allocation2]  }
 0x1df   : >> { %780 = vst [vmem:[%s1198_s15 + $0x70] sm:$0xff] %v779_v43  ;;  %782 = vst [vmem:[%s1198_s15 + $0x78] sm:$0xff] %v781_v44  ;;  %s789_s15 = scalar_lea.vmem %s1535_s7, %s948_s14  }
 0x1e1 PF: > { %s1610_s17 = sand.u32 15, %s1640_s12   ;;  %s959_s18 = sshll.u32 %s1541_s9, 7 }
 0x1e2   : > { %s794_s21 = scalar_lea.vmem %s1480_s30, %s959_s18 [#allocation2]   ;;  %s796_s22 = scalar_lea.vmem %s1535_s7, %s959_s18  }
 0x1e3   : > { %p953_p13 = scmp.le.s32.totalorder %s1610_s17, 0 }
 0x1e4   : > { %s1212_s23 = smov (!%p953_p13), %s796_s22   ;;  %s1216_s24 = smov (!%p953_p13), %s794_s21  }
 0x1e5   : > { %887 = sbr.rel (%p953_p13) target bundleno = 502 (0x1f6), region = 127  ;;  %s1220_s25 = smov (!%p953_p13), 0  }
 0x1e6   : > { %s1224_s26 = smov (!%p953_p13), 0  }
 0x1ec LB: >> { %v806_v45 = vld [vmem:[%s1218_s24] sm:$0xff]  ;;  %s808_s28 = sadd.s32 1, %s1222_s25  ;;  %s800_s26 = sadd.s32 1, %s1226_s26   ;;  %s1226_s26 = sphi %s1224_s26, %s800_s26   ;;  %s1222_s25 = sphi %s1220_s25, %s1221_s25   ;;  %s1218_s24 = sphi %s1216_s24, %s813_s24   ;;  %s1214_s23 = sphi %s1212_s23, %s814_s23  }
 0x1ed   : >> { %807 = vst [vmem:[%s1214_s23] sm:$0xff] %v806_v45  ;;  %p809_p0 = scmp.ge.s32.totalorder %s808_s28, %s1610_s17  ;;  %p799_p1 = scmp.ge.s32.totalorder %s800_s26, %s1610_s17 }
 0x1ef   : >> { %s1644_s28 = smov (%p809_p0, %s808_s28), 0  ;;  %802 = sbr.rel (!%p799_p1) target bundleno = 492 (0x1ec), region = 133 }
 0x1f0   : >> { %s954_s29 = sshll.u32 %s1644_s28, 3  ;;  %s1221_s25 = smov %s1644_s28  }
 0x1f1   : >> { %s813_s24 = scalar_lea.vmem %s794_s21, %s954_s29 [#allocation2]   ;;  %s814_s23 = scalar_lea.vmem %s796_s22, %s954_s29  }
 0x1f6 PF: > { %p10_p2 = scmp.ge.s32.totalorder %s1266_s16, 5   ;;  %s1636_s12 = smov %s1190_s13 }
 0x1f7   : > { %s1637_s13 = smov %s1274_s19  ;;  %s1638_s14 = smov %s1266_s16 }
 0x1f8   :  { %12 = sbr.rel (!%p10_p2) target bundleno = 2 (0x2), region = 144 }

</bundles_post_ra>
